<compile_context>
chip_gen: v7x
topology: tpu7x:2x2x1
jax: 0.10.0
libtpu: 0.0.40
codegen_flags: <defaults>
</compile_context>

<pallas_src>
import functools

import jax
import jax.numpy as jnp
from jax.experimental import pallas as pl
from jax.experimental.pallas import tpu as pltpu

_MIB = 1024 * 1024


# ---------------------------------------------------------------------------
# Generation-aware VMEM budget
# ---------------------------------------------------------------------------


def _vmem_limit_bytes():
    """Scoped-VMEM limit for pallas_call, per TPU generation.

    v5e / v6e have 128 MiB VMEM per TensorCore -> large scoped limit.
    v7x has only 64 MiB per core; unknown / undetected -> safe 48 MiB that
    fits every generation.
    """
    try:
        kind = jax.devices()[0].device_kind.lower()
    except Exception:
        kind = ""
    if any(tag in kind for tag in ("v5 lite", "v5e", "v5litepod",
                                   "v6 lite", "v6e")):
        return 96 * _MIB
    return 48 * _MIB


# ---------------------------------------------------------------------------
# Kernels
# ---------------------------------------------------------------------------


def _bn_single_pass_kernel(x_ref, gamma_ref, beta_ref, o_ref, *, eps, inv_count):
    """Whole per-channel-block slab resident in VMEM: one read, one write.

    Sum and sum-of-squares are fused into the same traversal (no centered
    `x - mean` full-tile temporary)."""
    # x_ref: (N, TC, HW); gamma/beta: (1, TC, 1)
    x = x_ref[...].astype(jnp.float32)
    s = jnp.sum(x, axis=2, keepdims=True)                  # (N, TC, 1)
    q = jnp.sum(x * x, axis=2, keepdims=True)              # (N, TC, 1)
    mean = jnp.sum(s, axis=0, keepdims=True) * inv_count   # (1, TC, 1)
    ex2 = jnp.sum(q, axis=0, keepdims=True) * inv_count
    var = jnp.maximum(ex2 - mean * mean, 0.0)              # biased variance
    inv_std = jax.lax.rsqrt(var + eps)
    scale = gamma_ref[...] * inv_std
    shift = beta_ref[...] - mean * scale
    o_ref[...] = (x * scale + shift).astype(o_ref.dtype)


def _make_stats_kernel(t_hw, acc_lanes):
    """Pass 1: accumulate lane-dense per-channel partial sums while streaming."""
    n_chunks = t_hw // acc_lanes

    def kernel(x_ref, sum_ref, ssq_ref):
        n = pl.program_id(1)
        h = pl.program_id(2)

        @pl.when((n == 0) & (h == 0))
        def _():
            sum_ref[...] = jnp.zeros_like(sum_ref)
            ssq_ref[...] = jnp.zeros_like(ssq_ref)

        x = x_ref[0].astype(jnp.float32)                   # (TC, T_HW)
        if acc_lanes == 1:
            # HW not a multiple of 128: plain cross-lane reduce fallback.
            sum_ref[...] += jnp.sum(x, axis=1, keepdims=True)
            ssq_ref[...] += jnp.sum(x * x, axis=1, keepdims=True)
        else:
            # Lane-aligned 128-wide chunks: pure VALU adds, unmasked stores;
            # the final 128 -> 1 reduce happens in the (tiny) pass-2 prologue.
            acc_s = x[:, 0:acc_lanes]
            acc_q = acc_s * acc_s
            for i in range(1, n_chunks):
                c = x[:, i * acc_lanes:(i + 1) * acc_lanes]
                acc_s = acc_s + c
                acc_q = acc_q + c * c
            sum_ref[...] += acc_s
            ssq_ref[...] += acc_q

    return kernel


def _bn_norm_kernel(x_ref, sum_ref, ssq_ref, gamma_ref, beta_ref, o_ref, *,
                    eps, inv_count):
    """Pass 2: fold stats + affine into scale/shift in-kernel, then apply."""
    # sum/ssq: (TC, acc_lanes); gamma/beta: (TC, 1); x/o: (1, TC, T_HW)
    s = jnp.sum(sum_ref[...], axis=1, keepdims=True)       # (TC, 1)
    q = jnp.sum(ssq_ref[...], axis=1, keepdims=True)
    mean = s * inv_count
    var = jnp.maximum(q * inv_count - mean * mean, 0.0)    # biased variance
    inv_std = jax.lax.rsqrt(var + eps)
    scale = gamma_ref[...] * inv_std                        # (TC, 1)
    shift = beta_ref[...] - mean * scale
    x = x_ref[...].astype(jnp.float32)                      # (1, TC, T_HW)
    o_ref[...] = (x * scale + shift).astype(o_ref.dtype)


# ---------------------------------------------------------------------------
# Tile-size helpers
# ---------------------------------------------------------------------------


def _pick_block(dim, align, max_size):
    """Largest multiple of `align` that divides `dim` and is <= max_size.

    Falls back to the full dim (always a legal block size)."""
    if dim % align == 0:
        t = min((max_size // align) * align, dim)
        while t >= align:
            if dim % t == 0:
                return t
            t -= align
    return dim


def _ensure_two_programs(c, tc):
    """Cap the channel block so the 'parallel' channel axis has >= 2 programs
    (keeps v7x's second TensorCore busy); tc must stay a multiple of 8."""
    n_blocks = -(-c // tc)
    if n_blocks >= 2 or c < 16:
        return tc
    half = (((c + 1) // 2) + 7) // 8 * 8
    return half if 0 < half < c else tc


def _single_pass_tc(n, c, hw, itemsize, footprint_budget):
    """Channel-block size for the single-pass kernel, or None if even one
    channel row does not fit.

    Footprint per channel of block:
      2x input buffer + 2x output buffer (double-buffered, input dtype)
      + ~2 full-tile f32 in-kernel temporaries (x in f32, scaled output)."""
    row_elems = n * hw
    per_ch = row_elems * (4 * itemsize + 8)
    if per_ch <= 0 or per_ch > footprint_budget:
        return None
    max_tc = footprint_budget // per_ch
    if max_tc >= c:
        tc = c
    elif max_tc >= 8:
        tc = (max_tc // 8) * 8          # ragged last block handled via cdiv grid
    else:
        return None
    return _ensure_two_programs(c, tc)


# ---------------------------------------------------------------------------
# Forward
# ---------------------------------------------------------------------------


def dsbn2d_forward(x, step, params, *, eps=1e-9,
                   vmem_limit_bytes=None,
                   single_pass_budget=None,
                   two_pass_tile_budget=None,
                   max_channel_tile=256,
                   max_lane_tile=8192):
    """Forward pass of DomainSpecificBatchNorm2d (training-mode batch norm).

    x: (N, C, H, W) NCHW tensor.
    step: int selecting which domain's BN parameters to use.
    params: list of (gamma, beta) tuples, each of shape (C,).
    Returns (y, step) with y of shape (N, C, H, W), same dtype as x.
    """
    if x.ndim != 4:
        raise ValueError("expected 4D input (got {}D input)".format(x.ndim))
    N, C, H, W = x.shape
    HW = H * W
    gamma, beta = params[step]

    x3 = x.reshape(N, C, HW)                     # free reshape, no transpose
    itemsize = jnp.dtype(x.dtype).itemsize
    inv_count = 1.0 / float(N * HW)
    eps = float(eps)

    vmem_limit = (vmem_limit_bytes if vmem_limit_bytes is not None
                  else _vmem_limit_bytes())
    headroom = 4 * _MIB
    usable = max(vmem_limit - headroom, 8 * _MIB)
    if single_pass_budget is None:
        single_pass_budget = usable

    gamma_f = gamma.astype(jnp.float32)
    beta_f = beta.astype(jnp.float32)

    # ---- single-pass path: whole per-channel-block slab fits in VMEM -------
    tc_sp = _single_pass_tc(N, C, HW, itemsize, single_pass_budget)
    if tc_sp is not None:
        n_cblk = -(-C // tc_sp)                  # ragged last block allowed
        kernel = functools.partial(
            _bn_single_pass_kernel, eps=eps, inv_count=inv_count)
        y3 = pl.pallas_call(
            kernel,
            out_shape=jax.ShapeDtypeStruct((N, C, HW), x.dtype),
            grid=(n_cblk,),
            in_specs=[
                pl.BlockSpec((N, tc_sp, HW), lambda c: (0, c, 0)),
                pl.BlockSpec((1, tc_sp, 1), lambda c: (0, c, 0)),
                pl.BlockSpec((1, tc_sp, 1), lambda c: (0, c, 0)),
            ],
            out_specs=pl.BlockSpec((N, tc_sp, HW), lambda c: (0, c, 0)),
            compiler_params=pltpu.CompilerParams(
                dimension_semantics=("parallel",),
                vmem_limit_bytes=vmem_limit),
            cost_estimate=pl.CostEstimate(
                flops=int(6 * N * C * HW),
                transcendentals=int(C),
                bytes_accessed=int(2 * N * C * HW * itemsize + 8 * C)),
        )(x3, gamma_f.reshape(1, C, 1), beta_f.reshape(1, C, 1))
        return y3.reshape(N, C, H, W), step

    # ---- two-pass streaming path -------------------------------------------
    # Channel block: multiple of 8 (ragged last block OK), >= 2 programs on the
    # parallel channel axis when possible.
    if C <= max_channel_tile:
        TC = C
    else:
        TC = max(8, (max_channel_tile // 8) * 8)
    TC = _ensure_two_programs(C, TC)

    if two_pass_tile_budget is None:
        # Per-buffer tile bytes so that 2x in + 2x out + ~2 f32 temps fit.
        two_pass_tile_budget = max(
            usable * itemsize // (4 * itemsize + 8), 128 * itemsize)

    max_hw_by_bytes = max(128, two_pass_tile_budget // max(1, TC * itemsize))
    T_HW = _pick_block(HW, 128, min(max_lane_tile, max_hw_by_bytes))
    if T_HW == HW and HW * TC * itemsize > two_pass_tile_budget and C >= 8:
        # HW not tileable at 128-lane granularity; shrink the channel block so
        # a full-HW row still fits the per-buffer budget.
        tc_fit = max(8, (two_pass_tile_budget // max(1, HW * itemsize)) // 8 * 8)
        TC = min(TC, tc_fit)

    acc_lanes = 128 if T_HW % 128 == 0 else 1
    grid = (-(-C // TC), N, HW // T_HW)

    # Pass 1: lane-dense per-channel partial sums / sums-of-squares,
    # accumulated in the resident output block across the N / HW axes.
    stats_kernel = _make_stats_kernel(T_HW, acc_lanes)
    ch_sum, ch_ssq = pl.pallas_call(
        stats_kernel,
        out_shape=(jax.ShapeDtypeStruct((C, acc_lanes), jnp.float32),
                   jax.ShapeDtypeStruct((C, acc_lanes), jnp.float32)),
        grid=grid,
        in_specs=[pl.BlockSpec((1, TC, T_HW), lambda c, n, h: (n, c, h))],
        out_specs=(pl.BlockSpec((TC, acc_lanes), lambda c, n, h: (c, 0)),
                   pl.BlockSpec((TC, acc_lanes), lambda c, n, h: (c, 0))),
        compiler_params=pltpu.CompilerParams(
            dimension_semantics=("parallel", "arbitrary", "arbitrary"),
            vmem_limit_bytes=vmem_limit),
        cost_estimate=pl.CostEstimate(
            flops=int(3 * N * C * HW),
            transcendentals=0,
            bytes_accessed=int(N * C * HW * itemsize + 8 * C * acc_lanes)),
    )(x3)

    # Pass 2: stream tiles again; fold stats + gamma/beta in-kernel and write
    # y = x * scale + shift (no tiny XLA epilogue between the passes).
    norm_kernel = functools.partial(_bn_norm_kernel, eps=eps, inv_count=inv_count)
    y3 = pl.pallas_call(
        norm_kernel,
        out_shape=jax.ShapeDtypeStruct((N, C, HW), x.dtype),
        grid=grid,
        in_specs=[
            pl.BlockSpec((1, TC, T_HW), lambda c, n, h: (n, c, h)),
            pl.BlockSpec((TC, acc_lanes), lambda c, n, h: (c, 0)),
            pl.BlockSpec((TC, acc_lanes), lambda c, n, h: (c, 0)),
            pl.BlockSpec((TC, 1), lambda c, n, h: (c, 0)),
            pl.BlockSpec((TC, 1), lambda c, n, h: (c, 0)),
        ],
        out_specs=pl.BlockSpec((1, TC, T_HW), lambda c, n, h: (n, c, h)),
        compiler_params=pltpu.CompilerParams(
            dimension_semantics=("parallel", "parallel", "parallel"),
            vmem_limit_bytes=vmem_limit),
        cost_estimate=pl.CostEstimate(
            flops=int(2 * N * C * HW),
            transcendentals=int(C),
            bytes_accessed=int(2 * N * C * HW * itemsize
                               + 8 * C * acc_lanes + 8 * C)),
    )(x3, ch_sum, ch_ssq, gamma_f.reshape(C, 1), beta_f.reshape(C, 1))

    return y3.reshape(N, C, H, W), step


def make_dsbn_params(num_channel, num_domains=1):
    # Default nn.BatchNorm2d init (weights_init_kaiming does not match
    # 'BatchNorm2d', so gamma=1, beta=0).
    params = []
    for _ in range(num_domains):
        gamma = jnp.ones((num_channel,), jnp.float32)
        beta = jnp.zeros((num_channel,), jnp.float32)
        params.append((gamma, beta))
    return params


# ---------------------------------------------------------------------------
# Demo / self-check
# ---------------------------------------------------------------------------

if __name__ == "__main__":
    root = jax.random.PRNGKey(0)
    k1, k2, k3, k4 = jax.random.split(root, 4)

    # --- small shape consistent with the module (single-pass path) ----------
    N, C, H, W = 2, 4, 16, 16
    x = jax.random.normal(k1, (N, C, H, W), dtype=jnp.float32)
    params = make_dsbn_params(C, num_domains=2)
    step = 0

    y, step_out = dsbn2d_forward(x, step, params, eps=1e-9)
    y = jax.block_until_ready(y)

    mean = jnp.mean(x, axis=(0, 2, 3), keepdims=True)
    var = jnp.mean((x - mean) ** 2, axis=(0, 2, 3), keepdims=True)
    y_ref = (x - mean) * jax.lax.rsqrt(var + 1e-9)
    assert y.shape == (N, C, H, W)
    assert y.dtype == x.dtype
    assert float(jnp.max(jnp.abs(y - y_ref))) < 1e-4
    assert step_out == step

    # --- larger shape forced onto the tiled two-pass streaming path ---------
    N2, C2, H2, W2 = 2, 8, 32, 32
    x2 = jax.random.normal(k2, (N2, C2, H2, W2), dtype=jnp.float32) * 3.0 + 0.5
    g2 = jax.random.uniform(k3, (C2,), jnp.float32, 0.5, 1.5)
    b2 = jax.random.normal(k4, (C2,), jnp.float32) * 0.1
    params2 = [(g2, b2)]

    y2, _ = dsbn2d_forward(x2, 0, params2, eps=1e-9,
                           single_pass_budget=0, max_lane_tile=256)
    y2 = jax.block_until_ready(y2)

    mean2 = jnp.mean(x2, axis=(0, 2, 3), keepdims=True)
    var2 = jnp.mean((x2 - mean2) ** 2, axis=(0, 2, 3), keepdims=True)
    y2_ref = ((x2 - mean2) * jax.lax.rsqrt(var2 + 1e-9)
              * g2.reshape(1, C2, 1, 1) + b2.reshape(1, C2, 1, 1))
    assert float(jnp.max(jnp.abs(y2 - y2_ref))) < 2e-4

    print("KERNEL_OK")
</pallas_src>

<mosaic_0001>
module attributes {stable_mosaic.version = 11 : i64} {
  func.func @_bn_single_pass_kernel(%arg0: i32, %arg1: memref<2x4x256xf32, #tpu.memory_space<vmem>>, %arg2: memref<1x4x1xf32, #tpu.memory_space<vmem>>, %arg3: memref<1x4x1xf32, #tpu.memory_space<vmem>>, %arg4: memref<2x4x256xf32, #tpu.memory_space<vmem>>) attributes {dimension_semantics = [#tpu.dimension_semantics<parallel>], iteration_bounds = array<i64: 1>, scalar_prefetch = 0 : i64, scratch_operands = 0 : i64, tpu.core_type = #tpu.core_type<tc>, window_params = [{transform_indices = @transform_0, window_bounds = array<i64: 2, 4, 256>}, {transform_indices = @transform_1, window_bounds = array<i64: 1, 4, 1>}, {transform_indices = @transform_2, window_bounds = array<i64: 1, 4, 1>}, {transform_indices = @transform_3, window_bounds = array<i64: 2, 4, 256>}]} {
    %c0 = arith.constant 0 : index
    %c0_0 = arith.constant 0 : index
    %c0_1 = arith.constant 0 : index
    %0 = vector.load %arg1[%c0, %c0_0, %c0_1] : memref<2x4x256xf32, #tpu.memory_space<vmem>>, vector<2x4x256xf32>
    %cst = arith.constant dense<0.000000e+00> : vector<2x4xf32>
    %1 = vector.multi_reduction <add>, %0, %cst [2] : vector<2x4x256xf32> to vector<2x4xf32>
    %2 = vector.shape_cast %1 : vector<2x4xf32> to vector<2x4x1xf32>
    %3 = arith.mulf %0, %0 : vector<2x4x256xf32>
    %cst_2 = arith.constant dense<0.000000e+00> : vector<2x4xf32>
    %4 = vector.multi_reduction <add>, %3, %cst_2 [2] : vector<2x4x256xf32> to vector<2x4xf32>
    %5 = vector.shape_cast %4 : vector<2x4xf32> to vector<2x4x1xf32>
    %cst_3 = arith.constant dense<0.000000e+00> : vector<4x1xf32>
    %6 = vector.multi_reduction <add>, %2, %cst_3 [0] : vector<2x4x1xf32> to vector<4x1xf32>
    %7 = vector.shape_cast %6 : vector<4x1xf32> to vector<1x4x1xf32>
    %cst_4 = arith.constant 0.001953125 : f32
    %8 = vector.broadcast %cst_4 : f32 to vector<1x4x1xf32>
    %9 = arith.mulf %7, %8 : vector<1x4x1xf32>
    %cst_5 = arith.constant dense<0.000000e+00> : vector<4x1xf32>
    %10 = vector.multi_reduction <add>, %5, %cst_5 [0] : vector<2x4x1xf32> to vector<4x1xf32>
    %11 = vector.shape_cast %10 : vector<4x1xf32> to vector<1x4x1xf32>
    %cst_6 = arith.constant 0.001953125 : f32
    %12 = vector.broadcast %cst_6 : f32 to vector<1x4x1xf32>
    %13 = arith.mulf %11, %12 : vector<1x4x1xf32>
    %14 = arith.mulf %9, %9 : vector<1x4x1xf32>
    %15 = arith.subf %13, %14 : vector<1x4x1xf32>
    %cst_7 = arith.constant 0.000000e+00 : f32
    %16 = vector.broadcast %cst_7 : f32 to vector<1x4x1xf32>
    %17 = arith.maximumf %15, %16 : vector<1x4x1xf32>
    %cst_8 = arith.constant 9.99999971E-10 : f32
    %18 = vector.broadcast %cst_8 : f32 to vector<1x4x1xf32>
    %19 = arith.addf %17, %18 : vector<1x4x1xf32>
    %20 = math.rsqrt %19 : vector<1x4x1xf32>
    %c0_9 = arith.constant 0 : index
    %c0_10 = arith.constant 0 : index
    %c0_11 = arith.constant 0 : index
    %21 = vector.load %arg2[%c0_9, %c0_10, %c0_11] : memref<1x4x1xf32, #tpu.memory_space<vmem>>, vector<1x4x1xf32>
    %22 = arith.mulf %21, %20 : vector<1x4x1xf32>
    %c0_12 = arith.constant 0 : index
    %c0_13 = arith.constant 0 : index
    %c0_14 = arith.constant 0 : index
    %23 = vector.load %arg3[%c0_12, %c0_13, %c0_14] : memref<1x4x1xf32, #tpu.memory_space<vmem>>, vector<1x4x1xf32>
    %24 = arith.mulf %9, %22 : vector<1x4x1xf32>
    %25 = arith.subf %23, %24 : vector<1x4x1xf32>
    %26 = vector.broadcast %22 : vector<1x4x1xf32> to vector<2x4x256xf32>
    %27 = arith.mulf %0, %26 : vector<2x4x256xf32>
    %28 = vector.broadcast %25 : vector<1x4x1xf32> to vector<2x4x256xf32>
    %29 = arith.addf %27, %28 : vector<2x4x256xf32>
    %c0_15 = arith.constant 0 : index
    %c0_16 = arith.constant 0 : index
    %c0_17 = arith.constant 0 : index
    %30 = vector.load %arg4[%c0_15, %c0_16, %c0_17] : memref<2x4x256xf32, #tpu.memory_space<vmem>>, vector<2x4x256xf32>
    tpu.vector_store %arg4[%c0_15, %c0_16, %c0_17], %29 {strides = array<i32>} : memref<2x4x256xf32, #tpu.memory_space<vmem>>, vector<2x4x256xf32>,
    return
  }
  func.func @transform_0(%arg0: i32) -> (i32, i32, i32) {
    %c0_i32 = arith.constant 0 : i32
    %c0_i32_0 = arith.constant 0 : i32
    %c0_i32_1 = arith.constant 0 : i32
    return %c0_i32, %arg0, %c0_i32_0 : i32, i32, i32
  }
  func.func @transform_1(%arg0: i32) -> (i32, i32, i32) {
    %c0_i32 = arith.constant 0 : i32
    %c0_i32_0 = arith.constant 0 : i32
    %c0_i32_1 = arith.constant 0 : i32
    return %c0_i32, %arg0, %c0_i32_0 : i32, i32, i32
  }
  func.func @transform_2(%arg0: i32) -> (i32, i32, i32) {
    %c0_i32 = arith.constant 0 : i32
    %c0_i32_0 = arith.constant 0 : i32
    %c0_i32_1 = arith.constant 0 : i32
    return %c0_i32, %arg0, %c0_i32_0 : i32, i32, i32
  }
  func.func @transform_3(%arg0: i32) -> (i32, i32, i32) {
    %c0_i32 = arith.constant 0 : i32
    %c0_i32_0 = arith.constant 0 : i32
    %c0_i32_1 = arith.constant 0 : i32
    return %c0_i32, %arg0, %c0_i32_0 : i32, i32, i32
  }
}

</mosaic_0001>

<bundles_post_ra>
// kernel: tpu_custom_call.1
= control target key start
LH: loop header
LB: loop body
LE: loop exit
PB: predicated region body
PF: predicated region fallthrough
CT: control target
= control target key end

     0   :  { %8 = vsyncpa [#allocation3], 0  ;;  %s281_s0 = inlined_call_operand.hbm [shape: f32[2,4,256], index: 0, kind: input, shape index: {}]   ;;  %s282_s1 = inlined_call_operand.vmem [shape: f32[1,4,1], index: 1, kind: input, shape index: {}]   ;;  %s283_s2 = inlined_call_operand.vmem [shape: f32[1,4,1], index: 2, kind: input, shape index: {}]   ;;  %s284_s3 = inlined_call_operand.hbm [shape: f32[2,4,256], index: 3, kind: output, shape index: {}]  }
   0x1   :  { %9 = vsyncpa [#allocation4], 0  ;;  %s191_s12 = smov [#allocation2]   ;;  %s143_s16 = scalar_lea.hbm %s281_s0, 256 }
   0x2   :  { %s15_s13 = sshll.u32 %s191_s12, 4  ;;  %p144_p0 = scmp.ne.s32.totalorder %s281_s0, %s143_s16  ;;  %s16_s13 = int_to_ptr.vmem [resolvable:$true] %s15_s13 }
   0x3   :  { %p147_p1 = scmp.lt.u32.totalorder %s143_s16, %s281_s0 }
   0x5   :  { %p149_p2 = pnand %p147_p1, %p144_p0 }
   0x7   :  { %152 = shalt.err (!%p149_p2)
}
   0x8   :  { %s153_s21 = scalar_lea.vmem %s16_s13, 256  ;;  %p158_p4 = scmp.lt.s32.totalorder %s16_s13, %s16_s13 }
   0x9   :  { %p154_p3 = scmp.ne.s32.totalorder %s16_s13, %s153_s21  ;;  %p159_p5 = scmp.lt.s32.totalorder %s153_s21, %s153_s21 }
   0xb   :  { %p160_p6 = por %p159_p5, %p158_p4 }
   0xd   :  { %p161_p7 = pnand %p160_p6, %p154_p3 }
   0xf   :  { %164 = shalt.err (!%p161_p7)
}
  0x10   :  { %s192_s22 = smov 128   ;;  %s193_s23 = smov 8  }
  0x11   :  { %21 = dma.hbm_to_vmem [thread:$0]  %s281_s0, 256, %s16_s13, [#allocation3], %s192_s22, %s192_s22, %s193_s23  }
  0x12   :  { %187 = dma.done.wait [#allocation3], 256  }
  0x13   :  { %188 = vsyncadd [#allocation3], 4294967040  ;;  %vm37_vm0 = vcmask 1043456   ;;  %v232_v0 = vld [vmem:[#allocation2] sm:$0xff]  ;;  %v234_v1 = vld [vmem:[#allocation2 + $0x8] sm:$0xff]  ;;  %v194_v20 = vmov 0   ;;  %v91_v45 = vlaneseq }
  0x14   :  { %v33_v2 = vcombine.high %v232_v0, %v232_v0  ;;  %v38_v3 = vsel %vm37_vm0, %v232_v0, 0.0  ;;  %v48_v4 = vmul.f32 %v232_v0, %v232_v0  ;;  %v34_v5 = vcombine.high %v234_v1, %v234_v1  ;;  %137 = vset.pattern.permute.xlu0 %v194_v20  ;;  %138 = vset.pattern.permute.xlu1 %v194_v20  ;;  %v79_v37 = vld [vmem:[%s282_s1] sm:$0xf]  ;;  %s196_s1 = smov [#allocation5]  }
  0x15   :  { %v43_v6 = vsel %vm37_vm0, %v234_v1, 0.0  ;;  %v49_v7 = vmul.f32 %v234_v1, %v234_v1  ;;  %v81_v40 = vld [vmem:[%s283_s2] sm:$0xf]  ;;  %v195_v43 = vmov 839922192   ;;  %v92_v47 = vshrl.u32 %v91_v45, 7 }
  0x16   :  { %v39_v8 = vsel %vm37_vm0, %v33_v2, 0.0  ;;  %v52_v9 = vcombine.high %v48_v4, %v48_v4  ;;  %v56_v10 = vsel %vm37_vm0, %v48_v4, 0.0  ;;  %v44_v11 = vsel %vm37_vm0, %v34_v5, 0.0  ;;  %s119_s29 = sshll.u32 %s196_s1, 4  ;;  %s120_s29 = int_to_ptr.vmem [resolvable:$true] %s119_s29 }
  0x17   :  { %v40_v12 = vadd.f32 %v39_v8, %v38_v3  ;;  %v53_v13 = vcombine.high %v49_v7, %v49_v7  ;;  %v61_v15 = vsel %vm37_vm0, %v49_v7, 0.0  ;;  %v45_v17 = vadd.f32 %v44_v11, %v43_v6  ;;  %s165_s2 = scalar_lea.vmem %s120_s29, 256  ;;  %p170_p9 = scmp.lt.s32.totalorder %s120_s29, %s120_s29 }
  0x18   :  { %v57_v14 = vsel %vm37_vm0, %v52_v9, 0.0  ;;  %v89_v44 = vunpack.c.l.s4 %v195_v43  ;;  %p166_p8 = scmp.ne.s32.totalorder %s120_s29, %s165_s2  ;;  %p171_p10 = scmp.lt.s32.totalorder %s165_s2, %s165_s2 }
  0x19   :  { %41 = vadd.xlane.f32.xlu0 %v40_v12  ;;  %v58_v16 = vadd.f32 %v57_v14, %v56_v10  ;;  %v62_v18 = vsel %vm37_vm0, %v53_v13, 0.0 }
  0x1a   :  { %v63_v19 = vadd.f32 %v62_v18, %v61_v15  ;;  %v90_v46 = vunpack.c.0.s8 %v89_v44  ;;  %p172_p11 = por %p171_p10, %p170_p9 }
  0x1b   :  { %59 = vadd.xlane.f32.xlu1 %v58_v16 }
  0x1c   :  { %v93_v48 = vsub.s32 %v90_v46, %v92_v47  ;;  %p173_p12 = pnand %p172_p11, %p166_p8 }
  0x1d   :  { %46 = vadd.xlane.f32.xlu0 %v45_v17 }
  0x1f   :  { %64 = vadd.xlane.f32.xlu1 %v63_v19 }
  0xa6   :  { %v42_v21 = vpop.xlane.xlu0 %41 }
  0xa7   :  { %v66_v24 = vsel %vm37_vm0, %v42_v21, 0.0 }
  0xa8   :  { %v60_v22 = vpop.xlane.xlu1 %59 }
  0xa9   :  { %v70_v28 = vsel %vm37_vm0, %v60_v22, 0.0 }
  0xaa   :  { %v47_v23 = vpop.xlane.xlu0 %46 }
  0xab   :  { %v67_v25 = vsel %vm37_vm0, %v47_v23, 0.0 }
  0xac   :  { %v68_v26 = vadd.f32 %v67_v25, %v66_v24  ;;  %v65_v27 = vpop.xlane.xlu1 %64 }
  0xad   :  { %v71_v29 = vsel %vm37_vm0, %v65_v27, 0.0 }
  0xae   :  { %v69_v30 = vmul.f32 0.001953125, %v68_v26  ;;  %v72_v31 = vadd.f32 %v71_v29, %v70_v28 }
  0xb0   :  { %v74_v32 = vmul.f32 %v69_v30, %v69_v30  ;;  %v73_v33 = vmul.f32 0.001953125, %v72_v31 }
  0xb2   :  { %v75_v34 = vsub.f32 %v73_v33, %v74_v32 }
  0xb4   :  { %v76_v35 = vmax.f32 %v75_v34, 0.0 }
  0xb6   :  { %v77_v36 = vadd.f32 1e-09, %v76_v35 }
  0xb8   :  { %141 = vrsqrt.f32 %v77_v36 }
  0xc2   :  { %v142_v38 = vpop.eup %141 }
  0xc3   :  { %v80_v39 = vmul.f32 %v142_v38, %v79_v37 }
  0xc5   :  { %86 = vperm.xlu0 %137, %v80_v39   ;;  %v82_v41 = vmul.f32 %v80_v39, %v69_v30 }
  0xc7   :  { %v83_v42 = vsub.f32 %v81_v40, %v82_v41 }
  0xc9   :  { %100 = vperm.xlu1 %138, %v83_v42  }
 0x144   :  { %v87_v49 = vpop.permute.xlu0 %86 }
 0x145   :  { %v94_v50 = vrot.slane %v87_v49, %v93_v48 }
 0x147   :  { %v96_v52 = vmul.f32 %v94_v50, %v232_v0  ;;  %v97_v53 = vmul.f32 %v94_v50, %v234_v1 }
 0x148   :  { %v101_v51 = vpop.permute.xlu1 %100 }
 0x149   :  { %v108_v54 = vrot.slane %v101_v51, %v93_v48 }
 0x14b   :  { %v110_v55 = vadd.f32 %v108_v54, %v96_v52  ;;  %v111_v56 = vadd.f32 %v108_v54, %v97_v53 }
 0x14d   :  { %112 = vst [vmem:[#allocation5] sm:$0xff] %v110_v55  ;;  %113 = vst [vmem:[#allocation5 + $0x8] sm:$0xff] %v111_v56 }
 0x14e   :  { %176 = shalt.err (!%p173_p12)
}
 0x14f   :  { %s177_s5 = scalar_lea.hbm %s284_s3, 256 }
 0x150   :  { %p178_p13 = scmp.ne.s32.totalorder %s284_s3, %s177_s5  ;;  %p181_p0 = scmp.lt.u32.totalorder %s177_s5, %s284_s3 }
 0x152   :  { %p183_p1 = pnand %p181_p0, %p178_p13 }
 0x154   :  { %186 = shalt.err (!%p183_p1)
}
 0x155   :  { %125 = dma.vmem_to_hbm [thread:$0]  %s120_s29, 256, %s284_s3, [#allocation4], %s192_s22, %s192_s22, %s193_s23  }
 0x156   :  { %189 = dma.done.wait [#allocation4], 256  }
 0x157   :  { %190 = vsyncadd [#allocation4], 4294967040 }
 0x158   :  { %129 = vsyncpa [#allocation3], 1 }
 0x159   :  { %130 = vsyncpa [#allocation4], 1 }

</bundles_post_ra>
